<compile_context>
chip_gen: v7x
topology: tpu7x:2x2x1
jax: 0.10.0
libtpu: 0.0.40
codegen_flags: <defaults>
</compile_context>

<pallas_src>
import math
import numpy as np
import jax
import jax.numpy as jnp
from jax.experimental import pallas as pl
from jax.experimental.pallas import tpu as pltpu


# ----------------------------- Pallas kernel --------------------------------
def patch_embed_kernel(x_ref, w_ref, pe_ref, o_ref):
    """One grid step handles TN sequences.

    x_ref  : (TN, P, C)   bf16 patches (C = patch_len)
    w_ref  : (3*C, D)     bf16 fused conv weights; rows are k-major:
                          w_ref[k*C + c, d] == W_torch[d, c, k]
    pe_ref : (1, P, D)    f32 sinusoidal positional embedding
    o_ref  : (TN, P, D)   f32 output
    """
    tn, P, C = x_ref.shape
    D = o_ref.shape[2]

    x = x_ref[...]                                               # (TN, P, C) bf16
    # Circular (kernel-size-3) wrap done in VMEM — no padded HBM copy.
    x_prev = jnp.concatenate([x[:, P - 1:, :], x[:, :P - 1, :]], axis=1)
    x_next = jnp.concatenate([x[:, 1:, :], x[:, :1, :]], axis=1)
    # Fuse the 3 taps along the contracting axis: K = 3*C in one MXU matmul.
    xk = jnp.concatenate([x_prev, x, x_next], axis=-1)           # (TN, P, 3C)

    w = w_ref[...]                                               # (3C, D) bf16
    pe = pe_ref[...]                                             # (1, P, D) f32

    if P % 8 == 0:
        # Sublane-aligned: flatten to (TN*P, 3C) so the MXU gets M = TN*P.
        acc = jnp.dot(xk.reshape(tn * P, 3 * C), w,
                      preferred_element_type=jnp.float32)        # (TN*P, D) f32
        o_ref[...] = (acc.reshape(tn, P, D) + pe).astype(o_ref.dtype)
    else:
        # Fallback (unaligned P): per-sequence dots, still fused K = 3C.
        for n in range(tn):                                      # static unroll
            acc = jnp.dot(xk[n], w, preferred_element_type=jnp.float32)
            o_ref[n] = (acc + pe[0]).astype(o_ref.dtype)


def _choose_block_n(N, P, C, D):
    """Pick TN = sequences per grid step.

    Largest divisor of N such that:
      * grid length N//TN >= 2 when N >= 2 (so v7x's two TCs both get work),
      * double-buffered bf16 input + f32 output blocks plus the in-kernel
        3C-wide concat stay well under a conservative VMEM budget
        (v7x: 64 MiB physical / 32 MiB default scoped),
      * TN*P rows capped (~1024) — plenty of M for the MXU.
    """
    budget = 12 * 1024 * 1024
    best = 1
    for tn in range(1, N + 1):
        if N % tn:
            continue
        if N >= 2 and N // tn < 2:
            continue
        vmem = (2 * tn * P * C * 2          # double-buffered bf16 input blocks
                + 2 * tn * P * D * 4        # double-buffered f32 output blocks
                + 4 * tn * P * 3 * C * 2)   # in-kernel shifted copies + concat
        if vmem > budget:
            continue
        if tn * P > 1024:
            continue
        best = tn
    return best


def patch_embedding_pallas(x, conv_w, pe, patch_len, stride):
    """x: (B, n_vars, L) float32. conv_w: (d_model, patch_len, 3) (PyTorch layout).
    Returns (out (B*n_vars, P, d_model) float32, n_vars)."""
    B, n_vars, L = x.shape
    d_model = conv_w.shape[0]

    # --- glue (plain JAX): replication pad + unfold + reshape ----------------
    x_pad = jnp.concatenate(
        [x, jnp.repeat(x[..., -1:], stride, axis=-1)], axis=-1)      # (B,V,L+stride)
    P = (L + stride - patch_len) // stride + 1
    gather_idx = (jnp.arange(P)[:, None] * stride
                  + jnp.arange(patch_len)[None, :])                  # (P, patch_len)
    patches = x_pad[..., gather_idx]                                 # (B,V,P,C)
    N = B * n_vars
    # bf16 activations: halves HBM read traffic; MXU-native input format.
    patches = patches.reshape(N, P, patch_len).astype(jnp.bfloat16)  # (N,P,C)

    # Fused conv weights: (D, C, 3) -> (3, C, D) -> (3C, D), k-major rows, bf16.
    w = (jnp.transpose(conv_w, (2, 1, 0))
         .reshape(3 * patch_len, d_model).astype(jnp.bfloat16))      # (3C, D)
    pe_blk = pe[:P].astype(jnp.float32)[None]                        # (1, P, D)

    TN = _choose_block_n(N, P, patch_len, d_model)
    grid = (N // TN,)

    cost = pl.CostEstimate(
        flops=2 * N * P * (3 * patch_len) * d_model,
        transcendentals=0,
        bytes_accessed=(patches.size * 2 + w.size * 2
                        + pe_blk.size * 4 + N * P * d_model * 4))

    # NOTE: output last dim = d_model; lane-dense only when d_model >= 128
    # (true in production configs). No output-reshape trick applied here.
    out = pl.pallas_call(
        patch_embed_kernel,
        out_shape=jax.ShapeDtypeStruct((N, P, d_model), jnp.float32),
        grid_spec=pltpu.PrefetchScalarGridSpec(
            num_scalar_prefetch=0,
            grid=grid,
            in_specs=[
                pl.BlockSpec((TN, P, patch_len), lambda i: (i, 0, 0)),
                pl.BlockSpec((3 * patch_len, d_model), lambda i: (0, 0)),
                pl.BlockSpec((1, P, d_model), lambda i: (0, 0, 0)),
            ],
            out_specs=pl.BlockSpec((TN, P, d_model), lambda i: (i, 0, 0)),
        ),
        compiler_params=pltpu.CompilerParams(
            dimension_semantics=("parallel",)),
        cost_estimate=cost,
    )(patches, w, pe_blk)

    # TODO(synk): nn.Dropout is identity in eval mode; training-mode dropout not applied.
    return out, n_vars


# ------------------------- parameter construction ---------------------------
def make_params(key, d_model, patch_len):
    # TokenEmbedding: Conv1d(patch_len -> d_model, kernel=3, bias=False),
    # kaiming_normal_(fan_in, leaky_relu) init (deterministic via PRNGKey).
    fan_in = patch_len * 3
    gain = math.sqrt(2.0 / (1.0 + 0.01 ** 2))
    std = gain / math.sqrt(fan_in)
    conv_w = std * jax.random.normal(key, (d_model, patch_len, 3), jnp.float32)

    # PositionalEmbedding: standard sinusoid, max_len=5000.
    max_len = 5000
    pe = np.zeros((max_len, d_model), np.float32)
    position = np.arange(max_len, dtype=np.float32)[:, None]
    div_term = np.exp(np.arange(0, d_model, 2, dtype=np.float32)
                      * -(math.log(10000.0) / d_model))
    pe[:, 0::2] = np.sin(position * div_term)
    pe[:, 1::2] = np.cos(position * div_term)
    return conv_w, jnp.asarray(pe)


# --------------------------- pure-JAX reference ------------------------------
def patch_embedding_ref(x, conv_w, pe, patch_len, stride,
                        compute_dtype=jnp.float32):
    """Reference. compute_dtype=bfloat16 mirrors the kernel's input rounding
    (products/accumulation still f32) so the comparison isolates kernel math."""
    B, n_vars, L = x.shape
    x_pad = jnp.concatenate([x, jnp.repeat(x[..., -1:], stride, axis=-1)], -1)
    P = (L + stride - patch_len) // stride + 1
    idx = jnp.arange(P)[:, None] * stride + jnp.arange(patch_len)[None, :]
    patches = x_pad[..., idx].reshape(B * n_vars, P, patch_len)
    patches = patches.astype(compute_dtype).astype(jnp.float32)
    w = jnp.transpose(conv_w, (2, 1, 0)).astype(compute_dtype).astype(jnp.float32)
    xp = jnp.concatenate([patches[:, -1:], patches, patches[:, :1]], 1)
    y = sum(jnp.einsum("npc,cd->npd", xp[:, k:k + P], w[k],
                       precision=jax.lax.Precision.HIGHEST) for k in range(3))
    return y + pe[:P][None].astype(jnp.float32), n_vars


if __name__ == "__main__":
    B, n_vars, L = 2, 4, 64
    patch_len, stride, d_model = 16, 8, 32
    dropout = 0.1  # eval-mode => identity

    key = jax.random.PRNGKey(0)
    kx, kw = jax.random.split(key)
    x = jax.random.normal(kx, (B, n_vars, L), jnp.float32)
    conv_w, pe = make_params(kw, d_model, patch_len)

    out, nv = patch_embedding_pallas(x, conv_w, pe, patch_len, stride)
    out = jax.block_until_ready(out)

    # Tight check: reference computed from the same bf16-rounded inputs.
    ref_bf16, _ = patch_embedding_ref(x, conv_w, pe, patch_len, stride,
                                      compute_dtype=jnp.bfloat16)
    # Loose sanity check against the full-f32 module semantics
    # (difference = bf16 input rounding only).
    ref_f32, _ = patch_embedding_ref(x, conv_w, pe, patch_len, stride)

    assert nv == n_vars
    assert out.shape == ref_bf16.shape
    np.testing.assert_allclose(np.asarray(out), np.asarray(ref_bf16),
                               rtol=2e-3, atol=2e-3)
    np.testing.assert_allclose(np.asarray(out), np.asarray(ref_f32),
                               rtol=1e-1, atol=1e-1)
    print("KERNEL_OK")
</pallas_src>

<mosaic_0001>
module attributes {stable_mosaic.version = 11 : i64} {
  func.func @patch_embed_kernel(%arg0: i32, %arg1: memref<4x8x16xbf16, #tpu.memory_space<vmem>>, %arg2: memref<48x32xbf16, #tpu.memory_space<vmem>>, %arg3: memref<1x8x32xf32, #tpu.memory_space<vmem>>, %arg4: memref<4x8x32xf32, #tpu.memory_space<vmem>>) attributes {dimension_semantics = [#tpu.dimension_semantics<parallel>], iteration_bounds = array<i64: 2>, scalar_prefetch = 0 : i64, scratch_operands = 0 : i64, tpu.core_type = #tpu.core_type<tc>, window_params = [{transform_indices = @transform_0, window_bounds = array<i64: 4, 8, 16>}, {pipeline_mode = #tpu.pipeline_mode<synchronous>, transform_indices = @transform_1, window_bounds = array<i64: 48, 32>}, {pipeline_mode = #tpu.pipeline_mode<synchronous>, transform_indices = @transform_2, window_bounds = array<i64: 1, 8, 32>}, {transform_indices = @transform_3, window_bounds = array<i64: 4, 8, 32>}]} {
    %c0 = arith.constant 0 : index
    %c0_0 = arith.constant 0 : index
    %c0_1 = arith.constant 0 : index
    %0 = vector.load %arg1[%c0, %c0_0, %c0_1] : memref<4x8x16xbf16, #tpu.memory_space<vmem>>, vector<4x8x16xbf16>
    %1 = vector.extract_strided_slice %0 {offsets = [0, 7, 0], sizes = [4, 1, 16], strides = [1, 1, 1]} : vector<4x8x16xbf16> to vector<4x1x16xbf16>
    %2 = vector.extract_strided_slice %0 {offsets = [0, 0, 0], sizes = [4, 7, 16], strides = [1, 1, 1]} : vector<4x8x16xbf16> to vector<4x7x16xbf16>
    %3 = tpu.concatenate %1, %2 in 1 : vector<4x1x16xbf16>, vector<4x7x16xbf16> -> vector<4x8x16xbf16>
    %4 = vector.extract_strided_slice %0 {offsets = [0, 1, 0], sizes = [4, 7, 16], strides = [1, 1, 1]} : vector<4x8x16xbf16> to vector<4x7x16xbf16>
    %5 = vector.extract_strided_slice %0 {offsets = [0, 0, 0], sizes = [4, 1, 16], strides = [1, 1, 1]} : vector<4x8x16xbf16> to vector<4x1x16xbf16>
    %6 = tpu.concatenate %4, %5 in 1 : vector<4x7x16xbf16>, vector<4x1x16xbf16> -> vector<4x8x16xbf16>
    %7 = tpu.concatenate %3, %0, %6 in 2 : vector<4x8x16xbf16>, vector<4x8x16xbf16>, vector<4x8x16xbf16> -> vector<4x8x48xbf16>
    %c0_2 = arith.constant 0 : index
    %c0_3 = arith.constant 0 : index
    %8 = vector.load %arg2[%c0_2, %c0_3] : memref<48x32xbf16, #tpu.memory_space<vmem>>, vector<48x32xbf16>
    %c0_4 = arith.constant 0 : index
    %c0_5 = arith.constant 0 : index
    %c0_6 = arith.constant 0 : index
    %9 = vector.load %arg3[%c0_4, %c0_5, %c0_6] : memref<1x8x32xf32, #tpu.memory_space<vmem>>, vector<1x8x32xf32>
    %10 = vector.shape_cast %7 : vector<4x8x48xbf16> to vector<32x48xbf16>
    %cst = arith.constant dense<0.000000e+00> : vector<32x32xf32>
    %11 = tpu.matmul %10, %8, %cst {dimension_numbers = #tpu.dot_dimension_numbers<[1], [0], [0], [1], [0, 0, 1, 1], [], []>} : vector<32x48xbf16>, vector<48x32xbf16>, vector<32x32xf32> -> vector<32x32xf32>
    %12 = vector.shape_cast %11 : vector<32x32xf32> to vector<4x8x32xf32>
    %13 = vector.broadcast %9 : vector<1x8x32xf32> to vector<4x8x32xf32>
    %14 = arith.addf %12, %13 : vector<4x8x32xf32>
    %c0_7 = arith.constant 0 : index
    %c0_8 = arith.constant 0 : index
    %c0_9 = arith.constant 0 : index
    %15 = vector.load %arg4[%c0_7, %c0_8, %c0_9] : memref<4x8x32xf32, #tpu.memory_space<vmem>>, vector<4x8x32xf32>
    tpu.vector_store %arg4[%c0_7, %c0_8, %c0_9], %14 {strides = array<i32>} : memref<4x8x32xf32, #tpu.memory_space<vmem>>, vector<4x8x32xf32>,
    return
  }
  func.func @transform_0(%arg0: i32) -> (i32, i32, i32) {
    %c0_i32 = arith.constant 0 : i32
    %c0_i32_0 = arith.constant 0 : i32
    %c0_i32_1 = arith.constant 0 : i32
    return %arg0, %c0_i32, %c0_i32_0 : i32, i32, i32
  }
  func.func @transform_1(%arg0: i32) -> (i32, i32) {
    %c0_i32 = arith.constant 0 : i32
    %c0_i32_0 = arith.constant 0 : i32
    %c0_i32_1 = arith.constant 0 : i32
    return %c0_i32, %c0_i32_0 : i32, i32
  }
  func.func @transform_2(%arg0: i32) -> (i32, i32, i32) {
    %c0_i32 = arith.constant 0 : i32
    %c0_i32_0 = arith.constant 0 : i32
    %c0_i32_1 = arith.constant 0 : i32
    %c0_i32_2 = arith.constant 0 : i32
    return %c0_i32, %c0_i32_0, %c0_i32_1 : i32, i32, i32
  }
  func.func @transform_3(%arg0: i32) -> (i32, i32, i32) {
    %c0_i32 = arith.constant 0 : i32
    %c0_i32_0 = arith.constant 0 : i32
    %c0_i32_1 = arith.constant 0 : i32
    return %arg0, %c0_i32, %c0_i32_0 : i32, i32, i32
  }
}

</mosaic_0001>

<bundles_post_ra>
// kernel: tpu_custom_call.1
= control target key start
LH: loop header
LB: loop body
LE: loop exit
PB: predicated region body
PF: predicated region fallthrough
CT: control target
= control target key end

     0   :  { %8 = vsyncpa [#allocation3], 0  ;;  %s808_s0 = inlined_call_operand.vmem [shape: bf16[8,8,16], index: 0, kind: input, shape index: {}]   ;;  %s809_s1 = inlined_call_operand.vmem [shape: bf16[48,32], index: 1, kind: input, shape index: {}]   ;;  %s810_s2 = inlined_call_operand.vmem [shape: f32[1,8,32], index: 2, kind: input, shape index: {}]   ;;  %s811_s3 = inlined_call_operand.hbm [shape: f32[8,8,32], index: 3, kind: output, shape index: {}]  }
   0x1   :  { %10 = vsyncpa [#allocation3 + $0x1], 0  ;;  %s658_s12 = smov 0   ;;  %s660_s13 = smov 0  }
   0x2   :  { %s662_s14 = smov 0   ;;  %s664_s15 = smov 0  }
   0x3 LB: > { %s679_s16 = sadd.s32 4294967295, %s631_s15   ;;  %s480_s17 = sadd.s32 4294967294, %s631_s15   ;;  %s631_s15 = sphi %s664_s15, %s821_s15   ;;  %s627_s14 = sphi %s662_s14, %s820_s14   ;;  %s623_s13 = sphi %s660_s13, %s819_s13   ;;  %s619_s12 = sphi %s658_s12, %s818_s12  }
   0x4   : > { %s683_s18 = sadd.s32 1, %s631_s15   ;;  %s91_s19 = sadd.s32 1, %s627_s14 }
   0x5   : > { %s88_s20 = ssub.s32 %s631_s15, %s683_s18  ;;  %p101_p0 = scmp.ne.s32.totalorder %s627_s14, %s623_s13 }
   0x6   : > { %p89_p1 = scmp.eq.s32.totalorder %s88_s20, 0  ;;  %p102_p2 = scmp.eq.s32.totalorder %s679_s16, 1 }
   0x7   : > { %p107_p3 = scmp.ne.s32.totalorder %s623_s13, %s619_s12  ;;  %p108_p4 = scmp.eq.s32.totalorder %s480_s17, 1 }
   0x8   : > { %s694_s21 = scalar_select %p89_p1, %s627_s14, %s91_s19  }
   0x9   : > { %p696_p5 = por %p102_p2, %p101_p0  ;;  %p700_p6 = por %p108_p4, %p107_p3 }
   0xa   : > { %p483_p7 = scmp.ge.s32.totalorder %s631_s15, 1  ;;  %p141_p8 = scmp.lt.s32.totalorder %s631_s15, 3 }
   0xc   : > { %p142_p9 = pnand %p483_p7, %p141_p8 }
   0xd   : > { %s485_s24 = sshll.u32 (!%p142_p9), %s679_s16, 2  ;;  %v566_v0 = vld [vmem:[%s809_s1] sm:$0xff] (!%p142_p9)   ;;  %v567_v1 = vld [vmem:[%s809_s1 + $0x8] sm:$0xff] (!%p142_p9)   ;;  %v568_v2 = vld [vmem:[%s809_s1 + $0x10] sm:$0xff] (!%p142_p9)   ;;  %vm256_vm0 = vcmask (!%p142_p9), 1043456   ;;  %s633_s8 = smov (!%p142_p9), 16  }
   0xe   : > { %145 = sbr.rel (%p142_p9) target bundleno = 387 (0x183), region = 32  ;;  %p166_p10 = scmp.lt.s32.totalorder (!%p142_p9), %s485_s24, 7  ;;  %509 = vmatprep.subr.bf16.mxu0 (!%p142_p9), %v566_v0  ;;  %vm257_vm1 = vsmask.f32 (!%p142_p9), 3328  ;;  %vm229_vm2 = vcmask (!%p142_p9), 1040384   ;;  %vm283_vm6 = vcmask (!%p142_p9), 130048  }
   0xf   : > { %510 = vmatpush3.bf16.msra.mxu0 (!%p142_p9), %v566_v0  ;;  %vm230_vm3 = vsmask.f32 (!%p142_p9), 256  ;;  %vm721_vm4 = vmand (!%p142_p9), %vm256_vm0, %vm257_vm1  ;;  %s634_s9 = smov (!%p142_p9), 32   ;;  %vm296_vm7 = vcmask (!%p142_p9), 261120   ;;  %vm340_vm8 = vcmask (!%p142_p9), 392192   ;;  %s162_s10 = sand.u32 (!%p142_p9), 1, %s623_s13  }
  0x10   : > { %511 = vmatprep.subr.bf16.mxu0 (!%p142_p9), %v567_v1  ;;  %vm727_vm5 = vmand (!%p142_p9), %vm229_vm2, %vm230_vm3  ;;  %s484_s11 = sshll.u32 (!%p142_p9), %s162_s10, 5  ;;  %s503_s25 = sshll.u32 (!%p142_p9), %s679_s16, 9 }
  0x11   : > { %s164_s20 = scalar_lea.vmem (!%p142_p9), [#allocation2], %s484_s11  ;;  %s762_s28 = scalar_lea.hbm (!%p142_p9), %s811_s3, %s503_s25 }
  0x12   : > { %s767_s16 = scalar_lea.sflag (!%p142_p9), [#allocation3], %s162_s10  ;;  %s635_s30 = smov (!%p142_p9), [#allocation2]  }
  0x13   : > { %512 = vmatpush3.bf16.msra.mxu0 (!%p142_p9), %v567_v1  ;;  %s573_s4 = sshll.u32 (!%p142_p9), %s635_s30, 4  ;;  %s574_s4 = int_to_ptr.vmem [resolvable:$false] %s573_s4 }
  0x14   : > { %513 = vmatprep.subr.bf16.mxu0 (!%p142_p9), %v568_v2  ;;  %s575_s5 = scalar_lea.vmem (!%p142_p9), %s574_s4, 1024 }
  0x15   : > { %s823_s24 = smov (!%p166_p10, %s485_s24), 7 }
  0x16   : > { %s486_s29 = sshll.u32 %s823_s24, 2  ;;  %s418_s24 = sshll.u32 %s164_s20, 4  ;;  %s757_s24 = int_to_ptr.vmem [resolvable:$true] %s418_s24 }
  0x17   : > { %s169_s7 = scalar_lea.vmem %s808_s0, %s486_s29  ;;  %514 = vmatpush3.bf16.msra.mxu0 %v568_v2  ;;  %s569_s29 = scalar_lea.vmem %s757_s24, 512 }
  0x18   : > { %v562_v3 = vld [vmem:[%s169_s7 + $0x8] ss:$0 sps:$4 sm:$0xff]   ;;  %v563_v4 = vld [vmem:[%s169_s7] ss:$0 sps:$4 sm:$0xff]   ;;  %v564_v5 = vld [vmem:[%s169_s7 + $0xc] ss:$0 sps:$4 sm:$0xff]   ;;  %p570_p11 = scmp.ne.s32.totalorder %s757_s24, %s569_s29  ;;  %p576_p0 = scmp.lt.s32.totalorder %s757_s24, %s574_s4 }
  0x19   : > { %267 = vrot.lane.b32.xlu1 %v562_v3, %s633_s8  ;;  %v218_v6 = vshll.u32 %v562_v3, 16  ;;  %v565_v7 = vld [vmem:[%s169_s7 + $0x4] ss:$0 sps:$4 sm:$0xff]   ;;  %v198_v8 = vshrl.u32 %v562_v3, 16  ;;  %263 = vrot.lane.b32.xlu0 %v563_v4, %s633_s8  ;;  %v190_v9 = vshrl.u32 %v563_v4, 16  ;;  %v210_v10 = vshll.u32 %v563_v4, 16  ;;  %p577_p1 = scmp.lt.s32.totalorder %s575_s5, %s569_s29 }
  0x1a   : > { %v222_v11 = vshll.u32 %v564_v5, 16  ;;  %v202_v12 = vshrl.u32 %v564_v5, 16  ;;  %v194_v13 = vshrl.u32 %v565_v7, 16  ;;  %v214_v14 = vshll.u32 %v565_v7, 16  ;;  %v311_v3 = vld [vmem:[%s810_s2] sm:$0xff]  ;;  %p571_p12 = pnand %p570_p11, %p696_p5 }
  0x1b   : > { %v240_v15 = vrot.slane %v218_v6, 1  ;;  %v236_v16 = vrot.slane %v210_v10, 1  ;;  %v248_v17 = vrot.slane %v210_v10, 5  ;;  %v250_v23 = vrot.slane %v218_v6, 5  ;;  %p578_p2 = por %p577_p1, %p576_p0 }
  0x1c   : > { %v242_v18 = vrot.slane %v222_v11, 1  ;;  %v238_v19 = vrot.slane %v214_v14, 1  ;;  %v249_v20 = vrot.slane %v214_v14, 5  ;;  %v251_v22 = vrot.slane %v222_v11, 5  ;;  %p572_p13 = pneg %p571_p12 }
  0x1d   : > { %269 = vrot.lane.b32.xlu1 %v564_v5, %s633_s8  ;;  %265 = vrot.lane.b32.xlu0 %v565_v7, %s633_s8  ;;  %v237_v24 = vor.u32 %v236_v16, %v190_v9  ;;  %v241_v25 = vor.u32 %v240_v15, %v198_v8  ;;  %v200_v26 = vrot.slane %v198_v8, 3  ;;  %v217_v27 = vrot.slane %v198_v8, 7 }
  0x1e   : > { %v239_v28 = vor.u32 %v238_v19, %v194_v13  ;;  %v243_v29 = vor.u32 %v242_v18, %v202_v12  ;;  %v192_v31 = vrot.slane %v190_v9, 3  ;;  %v209_v32 = vrot.slane %v190_v9, 7  ;;  %p579_p3 = pnand %p578_p2, %p572_p13 }
  0x1f   : > { %v259_v33 = vsel %vm721_vm4, %v237_v24, %v248_v17  ;;  %v220_v34 = vor.u32 %v218_v6, %v217_v27  ;;  %v204_v35 = vrot.slane %v202_v12, 3  ;;  %v221_v36 = vrot.slane %v202_v12, 7 }
  0x20   : > { %v260_v37 = vsel %vm721_vm4, %v239_v28, %v249_v20  ;;  %v212_v38 = vor.u32 %v210_v10, %v209_v32  ;;  %v196_v39 = vrot.slane %v194_v13, 3  ;;  %v213_v40 = vrot.slane %v194_v13, 7 }
  0x21   : > { %277 = vrot.lane.b32.xlu1 %v260_v37, %s634_s9  ;;  %275 = vrot.lane.b32.xlu0 %v259_v33, %s634_s9  ;;  %v234_v41 = vsel %vm727_vm5, %v200_v26, %v220_v34  ;;  %v224_v42 = vor.u32 %v222_v11, %v221_v36  ;;  %v262_v43 = vsel %vm721_vm4, %v243_v29, %v251_v22 }
  0x22   : > { %v261_v44 = vsel %vm721_vm4, %v241_v25, %v250_v23  ;;  %v232_v45 = vsel %vm727_vm5, %v192_v31, %v212_v38  ;;  %v216_v46 = vor.u32 %v214_v14, %v213_v40 }
  0x23   : > { %v235_v47 = vsel %vm727_vm5, %v204_v35, %v224_v42 }
  0x24   : > { %v233_v48 = vsel %vm727_vm5, %v196_v39, %v216_v46 }
  0x25   : > { %281 = vrot.lane.b32.xlu1 %v262_v43, %s634_s9  ;;  %279 = vrot.lane.b32.xlu0 %v261_v44, %s634_s9 }
  0x8b   : > { %v268_v49 = vpop.permute.xlu1 %267  ;;  %v264_v50 = vpop.permute.xlu0 %263 }
  0x8c   : > { %v286_v53 = vsel %vm283_vm6, %v232_v45, %v264_v50  ;;  %v292_v60 = vsel %vm283_vm6, %v234_v41, %v268_v49 }
  0x8f   : > { %v270_v51 = vpop.permute.xlu1 %269  ;;  %v266_v52 = vpop.permute.xlu0 %265 }
  0x90   : > { %v289_v54 = vsel %vm283_vm6, %v233_v48, %v266_v52  ;;  %v295_v61 = vsel %vm283_vm6, %v235_v47, %v270_v51 }
  0x93   : > { %v278_v55 = vpop.permute.xlu1 %277  ;;  %v276_v56 = vpop.permute.xlu0 %275 }
  0x94   : > { %v300_v57 = vsel %vm296_vm7, %v289_v54, %v278_v55  ;;  %v298_v58 = vsel %vm296_vm7, %v286_v53, %v276_v56 }
  0x95   : > { %v491_v59 = vcombine.low %v298_v58, %v300_v57 }
  0x97   : > { %v282_v62 = vpop.permute.xlu1 %281  ;;  %v280_v63 = vpop.permute.xlu0 %279  ;;  %515 = vmatprep.mubr.msk.bf16.mxu0 %vm340_vm8, %v491_v59 }
  0x98   : > { %v304_v0 = vsel %vm296_vm7, %v295_v61, %v282_v62  ;;  %v302_v1 = vsel %vm296_vm7, %v292_v60, %v280_v63 }
  0x99   : > { %v492_v2 = vcombine.low %v302_v1, %v304_v0 }
  0x9b   : > { %516 = vmatmul.mubr.msk.bf16.vlgmr.msra.gmra.mrb[0].mxu0 %vm340_vm8, %v492_v2 }
 0x16e   : > { %v517_v4 = vpop.f32.mrb[0].mxu0 }
 0x16f   : > { %v398_v5 = vadd.f32 %v517_v4, %v311_v3  ;;  %v381_v6 = vpop.f32.mrb[1].mxu0 }
 0x170   : > { %v396_v7 = vadd.f32 %v381_v6, %v311_v3  ;;  %v518_v8 = vpop.f32.mrb[2].mxu0 }
 0x171   : > { %402 = vst.msk [vmem:[%s164_s20 + $0x10] sm:$0xff] %vm296_vm7, %v398_v5  ;;  %v399_v9 = vadd.f32 %v518_v8, %v311_v3  ;;  %v384_v10 = vpop.f32.mrb[3].mxu0 }
 0x172   : > { %400 = vst.msk [vmem:[%s164_s20] sm:$0xff] %vm296_vm7, %v396_v7  ;;  %v397_v11 = vadd.f32 %v384_v10, %v311_v3 }
 0x173   : > { %403 = vst.msk [vmem:[%s164_s20 + $0x18] sm:$0xff] %vm296_vm7, %v399_v9 }
 0x174   : > { %401 = vst.msk [vmem:[%s164_s20 + $0x8] sm:$0xff] %vm296_vm7, %v397_v11 }
 0x175   : > { %582 = shalt.err (!%p579_p3)
}
 0x176   : > { %s583_s6 = scalar_lea.hbm %s762_s28, 512  ;;  %s587_s9 = scalar_lea.hbm %s811_s3, 1024 }
 0x177   : > { %p584_p4 = scmp.ne.s32.totalorder %s762_s28, %s583_s6  ;;  %p588_p9 = scmp.lt.u32.totalorder %s762_s28, %s811_s3 }
 0x178   : > { %p589_p10 = scmp.lt.u32.totalorder %s587_s9, %s583_s6  ;;  %p591_p12 = scmp.lt.u32.totalorder %s583_s6, %s762_s28 }
 0x179   : > { %p585_p7 = pnand %p584_p4, %p696_p5 }
 0x17a   : > { %p590_p11 = por %p589_p10, %p588_p9 }
 0x17b   : > { %p586_p8 = pneg %p585_p7 }
 0x17c   : > { %p592_p13 = por %p591_p12, %p590_p11 }
 0x17e   : > { %p593_p0 = pnand %p592_p13, %p586_p8 }
 0x180   : > { %596 = shalt.err (!%p593_p0)
}
 0x181   : > { %s636_s17 = smov 128   ;;  %s637_s19 = smov 8  }
 0x182   : > { %519 = dma.vmem_to_hbm [thread:$0]  (%p696_p5), %s757_s24, 512, %s762_s28, %s767_s16, %s636_s17, %s636_s17, %s637_s19  }
 0x183 PF: > { %p525_p1 = scmp.ge.s32.totalorder %s631_s15, 2  ;;  %s433_s20 = sand.u32 1, %s619_s12  }
 0x184   : > { %s434_s25 = scalar_lea.sflag [#allocation3], %s433_s20 }
 0x185   : > { %p522_p2 = pnand %p525_p1, %p700_p6 }
 0x187   : > { %614 = dma.done.wait (!%p522_p2), %s434_s25, 512  }
 0x188   : > { %616 = vsyncadd (!%p522_p2), %s434_s25, 4294966784  ;;  %p13_p3 = scmp.ge.s32.totalorder %s683_s18, 4   ;;  %s818_s12 = smov %s623_s13 }
 0x189   : > { %s819_s13 = smov %s627_s14  ;;  %s820_s14 = smov %s694_s21 }
 0x18a   : > { %s821_s15 = smov %s683_s18  ;;  %15 = sbr.rel (!%p13_p3) target bundleno = 3 (0x3), region = 67 }
 0x191   :  { %439 = vsyncpa [#allocation3], 1 }
 0x192   :  { %441 = vsyncpa [#allocation3 + $0x1], 1 }

</bundles_post_ra>
